<compile_context>
chip_gen: v6e
topology: v6e:2x2x1
jax: 0.10.0
libtpu: 0.0.40
codegen_flags: <defaults>
</compile_context>

<pallas_src>
import functools

import jax
import jax.numpy as jnp
from jax.experimental import pallas as pl
from jax.experimental.pallas import tpu as pltpu


def _root_kernel(residual, x1_ref, x2_ref, w1_ref, w2_ref, bias_ref, o_ref):
    """One (Cout, tile_hw) output slab: split-dot (1x1 conv, BN scale folded)
    -> +bias -> (+residual) -> relu.  Lanes = spatial pixels."""
    x1 = x1_ref[0]                                       # (C1, T), activation dtype
    x2 = x2_ref[0]                                       # (C2, T)
    mm_dt = w1_ref.dtype                                 # bf16 fast path / f32 exact
    y = jnp.dot(w1_ref[...], x1.astype(mm_dt),
                preferred_element_type=jnp.float32)      # (Cout, T) f32
    y = y + jnp.dot(w2_ref[...], x2.astype(mm_dt),
                    preferred_element_type=jnp.float32)
    y = y + bias_ref[...]                                # (Cout, 1) broadcast, f32
    if residual:
        y = y + x1.astype(jnp.float32)                   # children[0]
    o_ref[0] = jnp.maximum(y, 0.0).astype(o_ref.dtype)   # ReLU


def _const_param_spec(shape):
    """BlockSpec for a grid-invariant operand; single-buffered when supported."""
    idx = lambda s, n: (0, 0)
    try:
        return pl.BlockSpec(shape, idx, pipeline_mode=pl.Buffered(1))
    except Exception:   # older JAX without pipeline_mode / Buffered
        return pl.BlockSpec(shape, idx)


def root_forward(x1, x2, weight, gamma, beta, running_mean, running_var,
                 *, residual=True, eps=1e-5, tile_hw=8192, mxu_dtype=None):
    """x1: (N, C1, H, W), x2: (N, C2, H, W)  [NCHW, like PyTorch].

    weight: (Cout, Cin, 1, 1) Conv2d weight (kernel_size=1, bias=False).
    Returns (N, Cout, H, W).
    """
    N, C1, H, W = x1.shape
    N2, C2, H2, W2 = x2.shape
    assert (N2, H2, W2) == (N, H, W)
    Cout, Cin, kh, kw = weight.shape
    assert Cin == C1 + C2 and kh == 1 and kw == 1
    if residual:
        assert Cout == C1, "residual add requires out_channels == children[0] channels"

    HW = H * W
    # Channel-major views: pure reshapes, no transpose / extra HBM pass.
    x1_cm = x1.reshape(N, C1, HW)
    x2_cm = x2.reshape(N, C2, HW)

    # Fold eval-mode BatchNorm: scale goes into the weight, bias stays f32.
    f32 = jnp.float32
    inv_std = 1.0 / jnp.sqrt(running_var.astype(f32) + eps)
    scale = gamma.astype(f32) * inv_std                               # (Cout,)
    bias = (beta.astype(f32) - running_mean.astype(f32) * scale).reshape(Cout, 1)

    # MXU dtype: bf16 when activations are f32 (native MXU on all generations),
    # otherwise keep the activation dtype.  mxu_dtype=jnp.float32 forces exact.
    if mxu_dtype is None:
        mm_dtype = jnp.bfloat16 if x1.dtype == jnp.float32 else x1.dtype
    else:
        mm_dtype = jnp.dtype(mxu_dtype)

    w = weight.reshape(Cout, Cin).astype(f32) * scale[:, None]        # fold BN scale
    w1 = w[:, :C1].astype(mm_dtype)
    w2 = w[:, C1:].astype(mm_dtype)

    act_isz = jnp.dtype(x1.dtype).itemsize
    out_isz = act_isz
    mm_isz = jnp.dtype(mm_dtype).itemsize

    # Generation-aware VMEM budgets (v5e/v6e: 128 MiB, v7x: 64 MiB per TC).
    try:
        vmem_cap = int(pltpu.get_tpu_info().vmem_capacity_bytes)
    except Exception:
        vmem_cap = 64 << 20                      # conservative (v7x) fallback
    tile_budget = min(int(vmem_cap * 0.45), 96 << 20)   # working-set target
    scoped_cap = min(int(vmem_cap * 0.85), 112 << 20)   # scoped-VMEM ceiling

    # Spatial tile: big (memory-bound op), lane-aligned (multiple of 128),
    # shrunk until the honest working-set estimate fits the budget.
    hw_pad = pl.cdiv(HW, 128) * 128
    tile = min(pl.cdiv(max(tile_hw, 128), 128) * 128, hw_pad)
    if N == 1 and hw_pad >= 256:
        # Guarantee >= 2 spatial tiles so both v7x TensorCores get work.
        tile = min(tile, pl.cdiv(pl.cdiv(HW, 2), 128) * 128)

    w_bufs = 1                                   # weights/bias single-buffered

    def _est(t):                                 # honest VMEM working set (bytes)
        act = 2 * (C1 + C2) * t * act_isz        # double-buffered input blocks
        out = 2 * Cout * t * out_isz             # double-buffered output block
        tmp = 2 * Cout * t * 4                   # f32 dot results / accumulator
        cst = (C1 + C2) * t * mm_isz if mm_isz != act_isz else 0   # in-kernel casts
        par = w_bufs * (Cout * Cin * mm_isz + Cout * 4)            # weights + bias
        return act + out + tmp + cst + par

    while tile > 128 and _est(tile) > tile_budget:
        tile -= 128

    grid = (pl.cdiv(HW, tile), N)                # spatial axis first (megacore)

    flops = 2 * N * HW * Cin * Cout
    bytes_accessed = (x1_cm.size * act_isz + x2_cm.size * act_isz
                      + w1.size * mm_isz + w2.size * mm_isz + bias.size * 4
                      + N * Cout * HW * out_isz)
    cost = pl.CostEstimate(flops=flops, transcendentals=0,
                           bytes_accessed=bytes_accessed)

    out_cm = pl.pallas_call(
        functools.partial(_root_kernel, residual),
        out_shape=jax.ShapeDtypeStruct((N, Cout, HW), x1.dtype),
        grid_spec=pltpu.PrefetchScalarGridSpec(
            num_scalar_prefetch=0,
            grid=grid,
            in_specs=[
                pl.BlockSpec((1, C1, tile), lambda s, n: (n, 0, s)),
                pl.BlockSpec((1, C2, tile), lambda s, n: (n, 0, s)),
                _const_param_spec((Cout, C1)),
                _const_param_spec((Cout, C2)),
                _const_param_spec((Cout, 1)),
            ],
            out_specs=pl.BlockSpec((1, Cout, tile), lambda s, n: (n, 0, s)),
        ),
        compiler_params=pltpu.CompilerParams(
            dimension_semantics=("parallel", "parallel"),
            vmem_limit_bytes=int(min(max(2 * _est(tile), 32 << 20), scoped_cap)),
        ),
        cost_estimate=cost,
    )(x1_cm, x2_cm, w1, w2, bias)

    return out_cm.reshape(N, Cout, H, W)


def _reference(x1, x2, weight, gamma, beta, running_mean, running_var,
               residual=True, eps=1e-5):
    """Pure-JAX reference (eval-mode BN) for sanity checking."""
    x = jnp.concatenate([x1, x2], axis=1)                          # (N, Cin, H, W)
    Cout, Cin = weight.shape[:2]
    w = weight.reshape(Cout, Cin)
    y = jnp.einsum("nchw,oc->nohw", x, w)
    inv_std = 1.0 / jnp.sqrt(running_var + eps)
    y = (y - running_mean[None, :, None, None]) * inv_std[None, :, None, None]
    y = y * gamma[None, :, None, None] + beta[None, :, None, None]
    if residual:
        y = y + x1
    return jnp.maximum(y, 0.0)


if __name__ == "__main__":
    key = jax.random.PRNGKey(0)
    k1, k2, k3, k4 = jax.random.split(key, 4)

    N, C1, C2, H, W = 2, 4, 4, 16, 16   # in_channels = 8, out_channels = 4
    Cout, Cin = C1, C1 + C2

    x1 = jax.random.normal(k1, (N, C1, H, W), dtype=jnp.float32)
    x2 = jax.random.normal(k2, (N, C2, H, W), dtype=jnp.float32)

    # Deterministic parameter init (synthetic, no checkpoint).
    weight = jax.random.normal(k3, (Cout, Cin, 1, 1), dtype=jnp.float32) * 0.1
    gamma = jnp.linspace(0.5, 1.5, Cout, dtype=jnp.float32)
    beta = jnp.linspace(-0.1, 0.1, Cout, dtype=jnp.float32)
    running_mean = jnp.linspace(-0.2, 0.2, Cout, dtype=jnp.float32)
    running_var = jnp.linspace(0.8, 1.2, Cout, dtype=jnp.float32)

    ref = _reference(x1, x2, weight, gamma, beta, running_mean, running_var,
                     residual=True)

    # Exact path: f32 MXU (bit-faithful to the folded-BN math).
    out_f32 = root_forward(x1, x2, weight, gamma, beta, running_mean,
                           running_var, residual=True, mxu_dtype=jnp.float32)
    out_f32 = jax.block_until_ready(out_f32)
    assert out_f32.shape == (N, Cout, H, W)
    assert jnp.allclose(out_f32, ref, atol=1e-4, rtol=1e-4), "f32 path mismatch"

    # Fast path (default): bf16 MXU with f32 accumulation.
    out_bf = root_forward(x1, x2, weight, gamma, beta, running_mean,
                          running_var, residual=True)
    out_bf = jax.block_until_ready(out_bf)
    assert jnp.allclose(out_bf, ref, atol=3e-2, rtol=3e-2), "bf16 path mismatch"

    # Non-residual branch (out_channels != children[0] channels).
    Cout2 = 8
    weight2 = jax.random.normal(k4, (Cout2, Cin, 1, 1), dtype=jnp.float32) * 0.1
    gamma2 = jnp.linspace(0.5, 1.5, Cout2, dtype=jnp.float32)
    beta2 = jnp.linspace(-0.1, 0.1, Cout2, dtype=jnp.float32)
    rm2 = jnp.linspace(-0.2, 0.2, Cout2, dtype=jnp.float32)
    rv2 = jnp.linspace(0.8, 1.2, Cout2, dtype=jnp.float32)
    out_nr = root_forward(x1, x2, weight2, gamma2, beta2, rm2, rv2,
                          residual=False, mxu_dtype=jnp.float32)
    out_nr = jax.block_until_ready(out_nr)
    ref_nr = _reference(x1, x2, weight2, gamma2, beta2, rm2, rv2, residual=False)
    assert jnp.allclose(out_nr, ref_nr, atol=1e-4, rtol=1e-4), "non-residual mismatch"

    print("KERNEL_OK")
</pallas_src>

<mosaic_0001>
module attributes {stable_mosaic.version = 11 : i64} {
  func.func @_root_kernel(%arg0: i32, %arg1: i32, %arg2: memref<1x4x256xf32, #tpu.memory_space<vmem>>, %arg3: memref<1x4x256xf32, #tpu.memory_space<vmem>>, %arg4: memref<4x4xf32, #tpu.memory_space<vmem>>, %arg5: memref<4x4xf32, #tpu.memory_space<vmem>>, %arg6: memref<4x1xf32, #tpu.memory_space<vmem>>, %arg7: memref<1x4x256xf32, #tpu.memory_space<vmem>>) attributes {dimension_semantics = [#tpu.dimension_semantics<parallel>, #tpu.dimension_semantics<parallel>], iteration_bounds = array<i64: 1, 2>, scalar_prefetch = 0 : i64, scratch_operands = 0 : i64, tpu.core_type = #tpu.core_type<tc>, window_params = [{transform_indices = @transform_0, window_bounds = array<i64: 1, 4, 256>}, {transform_indices = @transform_1, window_bounds = array<i64: 1, 4, 256>}, {pipeline_mode = #tpu.pipeline_mode<synchronous>, transform_indices = @transform_2, window_bounds = array<i64: 4, 4>}, {pipeline_mode = #tpu.pipeline_mode<synchronous>, transform_indices = @transform_3, window_bounds = array<i64: 4, 4>}, {pipeline_mode = #tpu.pipeline_mode<synchronous>, transform_indices = @transform_4, window_bounds = array<i64: 4, 1>}, {transform_indices = @transform_5, window_bounds = array<i64: 1, 4, 256>}]} {
    %c0 = arith.constant 0 : index
    %c0_0 = arith.constant 0 : index
    %c0_1 = arith.constant 0 : index
    %0 = vector.load %arg2[%c0, %c0_0, %c0_1] : memref<1x4x256xf32, #tpu.memory_space<vmem>>, vector<1x4x256xf32>
    %1 = vector.shape_cast %0 : vector<1x4x256xf32> to vector<4x256xf32>
    %c0_2 = arith.constant 0 : index
    %c0_3 = arith.constant 0 : index
    %c0_4 = arith.constant 0 : index
    %2 = vector.load %arg3[%c0_2, %c0_3, %c0_4] : memref<1x4x256xf32, #tpu.memory_space<vmem>>, vector<1x4x256xf32>
    %3 = vector.shape_cast %2 : vector<1x4x256xf32> to vector<4x256xf32>
    %c0_5 = arith.constant 0 : index
    %c0_6 = arith.constant 0 : index
    %4 = vector.load %arg4[%c0_5, %c0_6] : memref<4x4xf32, #tpu.memory_space<vmem>>, vector<4x4xf32>
    %cst = arith.constant dense<0.000000e+00> : vector<4x256xf32>
    %5 = tpu.matmul %4, %1, %cst {dimension_numbers = #tpu.dot_dimension_numbers<[1], [0], [0], [1], [0, 0, 1, 1], [], []>} : vector<4x4xf32>, vector<4x256xf32>, vector<4x256xf32> -> vector<4x256xf32>
    %c0_7 = arith.constant 0 : index
    %c0_8 = arith.constant 0 : index
    %6 = vector.load %arg5[%c0_7, %c0_8] : memref<4x4xf32, #tpu.memory_space<vmem>>, vector<4x4xf32>
    %cst_9 = arith.constant dense<0.000000e+00> : vector<4x256xf32>
    %7 = tpu.matmul %6, %3, %cst_9 {dimension_numbers = #tpu.dot_dimension_numbers<[1], [0], [0], [1], [0, 0, 1, 1], [], []>} : vector<4x4xf32>, vector<4x256xf32>, vector<4x256xf32> -> vector<4x256xf32>
    %8 = arith.addf %5, %7 : vector<4x256xf32>
    %c0_10 = arith.constant 0 : index
    %c0_11 = arith.constant 0 : index
    %9 = vector.load %arg6[%c0_10, %c0_11] : memref<4x1xf32, #tpu.memory_space<vmem>>, vector<4x1xf32>
    %10 = vector.broadcast %9 : vector<4x1xf32> to vector<4x256xf32>
    %11 = arith.addf %8, %10 : vector<4x256xf32>
    %12 = arith.addf %11, %1 : vector<4x256xf32>
    %cst_12 = arith.constant 0.000000e+00 : f32
    %13 = vector.broadcast %cst_12 : f32 to vector<4x256xf32>
    %14 = arith.maximumf %12, %13 : vector<4x256xf32>
    %c0_13 = arith.constant 0 : index
    %c0_14 = arith.constant 0 : index
    %c0_15 = arith.constant 0 : index
    %15 = vector.load %arg7[%c0_13, %c0_14, %c0_15] : memref<1x4x256xf32, #tpu.memory_space<vmem>>, vector<1x4x256xf32>
    %16 = vector.shape_cast %15 : vector<1x4x256xf32> to vector<4x256xf32>
    %17 = vector.shape_cast %14 : vector<4x256xf32> to vector<1x4x256xf32>
    tpu.vector_store %arg7[%c0_13, %c0_14, %c0_15], %17 {strides = array<i32>} : memref<1x4x256xf32, #tpu.memory_space<vmem>>, vector<1x4x256xf32>,
    return
  }
  func.func @transform_0(%arg0: i32, %arg1: i32) -> (i32, i32, i32) {
    %c0_i32 = arith.constant 0 : i32
    %c0_i32_0 = arith.constant 0 : i32
    return %arg1, %c0_i32, %arg0 : i32, i32, i32
  }
  func.func @transform_1(%arg0: i32, %arg1: i32) -> (i32, i32, i32) {
    %c0_i32 = arith.constant 0 : i32
    %c0_i32_0 = arith.constant 0 : i32
    return %arg1, %c0_i32, %arg0 : i32, i32, i32
  }
  func.func @transform_2(%arg0: i32, %arg1: i32) -> (i32, i32) {
    %c0_i32 = arith.constant 0 : i32
    %c0_i32_0 = arith.constant 0 : i32
    %c0_i32_1 = arith.constant 0 : i32
    return %c0_i32, %c0_i32_0 : i32, i32
  }
  func.func @transform_3(%arg0: i32, %arg1: i32) -> (i32, i32) {
    %c0_i32 = arith.constant 0 : i32
    %c0_i32_0 = arith.constant 0 : i32
    %c0_i32_1 = arith.constant 0 : i32
    return %c0_i32, %c0_i32_0 : i32, i32
  }
  func.func @transform_4(%arg0: i32, %arg1: i32) -> (i32, i32) {
    %c0_i32 = arith.constant 0 : i32
    %c0_i32_0 = arith.constant 0 : i32
    %c0_i32_1 = arith.constant 0 : i32
    return %c0_i32, %c0_i32_0 : i32, i32
  }
  func.func @transform_5(%arg0: i32, %arg1: i32) -> (i32, i32, i32) {
    %c0_i32 = arith.constant 0 : i32
    %c0_i32_0 = arith.constant 0 : i32
    return %arg1, %c0_i32, %arg0 : i32, i32, i32
  }
}

</mosaic_0001>

<bundles_post_ra>
// kernel: tpu_custom_call.1
= control target key start
LH: loop header
LB: loop body
LE: loop exit
PB: predicated region body
PF: predicated region fallthrough
CT: control target
= control target key end

     0   :  { %s1067_s0 = inlined_call_operand.hbm [shape: f32[2,4,256], index: 0, kind: input, shape index: {}]   ;;  %s1068_s1 = inlined_call_operand.hbm [shape: f32[2,4,256], index: 1, kind: input, shape index: {}]   ;;  %s1069_s2 = inlined_call_operand.vmem [shape: f32[4,4], index: 2, kind: input, shape index: {}]   ;;  %s1070_s3 = inlined_call_operand.vmem [shape: f32[4,4], index: 3, kind: input, shape index: {}]   ;;  %s1071_s4 = inlined_call_operand.vmem [shape: f32[4,1], index: 4, kind: input, shape index: {}]   ;;  %s1072_s5 = inlined_call_operand.hbm [shape: f32[2,4,256], index: 5, kind: output, shape index: {}]  }
   0x1   :  { %1073 = sst [smem:[#allocation11_spill]] %s1067_s0 }
   0x2   :  { %10 = vsyncpa [#allocation3], 0 }
   0x3   :  { %12 = vsyncpa [#allocation3 + $0x1], 0 }
   0x4   :  { %13 = vsyncpa [#allocation6], 0 }
   0x5   :  { %15 = vsyncpa [#allocation6 + $0x1], 0 }
   0x6   :  { %16 = vsyncpa [#allocation4], 0 }
   0x7   :  { %18 = vsyncpa [#allocation4 + $0x1], 0  ;;  %s892_s18 = smov 0   ;;  %s894_s19 = smov 0  }
   0x8   :  { %s896_s20 = smov 0   ;;  %s898_s21 = smov 0  }
   0x9   :  { %s900_s22 = smov 0   ;;  %s902_s23 = smov 0  }
   0xa LB: > { %s615_s24 = sadd.s32 4294967295, %s855_s23   ;;  %s616_s25 = sadd.s32 4294967294, %s855_s23   ;;  %s855_s23 = sphi %s902_s23, %s24_s23   ;;  %s851_s22 = sphi %s900_s22, %s1086_s22   ;;  %s847_s21 = sphi %s898_s21, %s1085_s21   ;;  %s843_s20 = sphi %s896_s20, %s1084_s20   ;;  %s839_s19 = sphi %s894_s19, %s1083_s19   ;;  %s835_s18 = sphi %s892_s18, %s1082_s18  }
   0xb   : > { %s33_s26 = sadd.s32 1, %s851_s22  ;;  %s45_s27 = sadd.s32 1, %s843_s20 }
   0xc   : > { %p34_p0 = scmp.ge.s32.totalorder %s33_s26, 2  ;;  %p52_p1 = scmp.ne.s32.totalorder %s843_s20, %s839_s19 }
   0xd   : > { %p53_p2 = scmp.eq.s32.totalorder %s855_s23, 0  ;;  %p58_p3 = scmp.ne.s32.totalorder %s839_s19, %s835_s18 }
   0xe   : > { %s1088_s26 = smov (%p34_p0, %s33_s26), 0  ;;  %p59_p5 = scmp.eq.s32.totalorder %s615_s24, 0 }
   0xf   : > { %p933_p4 = por %p53_p2, %p52_p1  ;;  %s40_s29 = ssub.s32 %s851_s22, %s1088_s26 }
  0x10   : > { %p175_p6 = scmp.eq.s32.totalorder %s615_s24, 1  ;;  %p43_p7 = scmp.eq.s32.totalorder %s40_s29, 0 }
  0x11   : > { %p939_p8 = por %p59_p5, %p58_p3  ;;  %p181_p10 = scmp.eq.s32.totalorder %s616_s25, 1 }
  0x12   : > { %p943_p9 = por %p175_p6, %p52_p1  ;;  %p660_p13 = scmp.lt.s32.totalorder %s855_s23, 2 }
  0x13   : > { %s948_s7 = scalar_select %p43_p7, %s843_s20, %s45_s27  }
  0x14   : > { %p950_p11 = por %p181_p10, %p58_p3  ;;  %s957_s9 = sand.u32 1, %s843_s20  }
  0x15   : > { %s619_s10 = sshll.u32 %s957_s9, 3  ;;  %s640_s11 = sshll.u32 %s851_s22, 7 }
  0x16   : > { %s1078_s0 = sld [smem:[#allocation11_spill]]  ;;  %s214_s15 = scalar_lea.vmem [#allocation2], %s619_s10 }
  0x17   : > { %s224_s16 = sshll.u32 %s214_s15, 4  ;;  %p966_p0 = pnand %p660_p13, %p933_p4  ;;  %s225_s16 = int_to_ptr.vmem [resolvable:$true] %s224_s16 }
  0x18   : > { %p625_p1 = scmp.ge.s32.totalorder %s855_s23, 1  ;;  %p250_p2 = scmp.lt.s32.totalorder %s855_s23, 3 }
  0x19   : > { %s211_s24 = scalar_lea.sflag [#allocation3], %s957_s9  ;;  %p717_p3 = pneg %p966_p0 }
  0x1a   : > { %s728_s25 = scalar_lea.vmem %s225_s16, 128  ;;  %s857_s27 = smov [#allocation2]  }
  0x1b   : > { %p729_p5 = scmp.ne.s32.totalorder %s225_s16, %s728_s25  ;;  %s733_s29 = sshll.u32 %s857_s27, 4  ;;  %s734_s29 = int_to_ptr.vmem [resolvable:$false] %s733_s29 }
  0x1c   : > { %s222_s14 = scalar_lea.hbm %s1078_s0, %s640_s11  ;;  %s735_s28 = scalar_lea.vmem %s734_s29, 256 }
  0x1d   : > { %p731_p6 = pnand %p729_p5, %p717_p3  ;;  %p736_p4 = scmp.lt.s32.totalorder %s225_s16, %s734_s29 }
  0x1e   : > { %p737_p10 = scmp.lt.s32.totalorder %s735_s28, %s728_s25 }
  0x1f   : > { %p732_p7 = pneg %p731_p6 }
  0x20   : > { %p738_p13 = por %p737_p10, %p736_p4 }
  0x22   : > { %p739_p12 = pnand %p738_p13, %p732_p7 }
  0x24   : > { %742 = shalt.err (!%p739_p12)
}
  0x25   : > { %652 = dma.hbm_to_vmem [thread:$0]  (!%p966_p0), %s222_s14, 128, %s225_s16, %s211_s24  }
  0x26   : > { %p984_p5 = pnand %p625_p1, %p250_p2  ;;  %s243_s25 = scalar_lea.hbm %s1068_s1, %s640_s11 }
  0x27   : > { %s235_s27 = scalar_lea.vmem [#allocation5], %s619_s10  ;;  %s232_s28 = scalar_lea.sflag [#allocation6], %s957_s9 }
  0x28   : > { %s245_s29 = sshll.u32 %s235_s27, 4  ;;  %s858_s14 = smov [#allocation5]   ;;  %s246_s29 = int_to_ptr.vmem [resolvable:$true] %s245_s29 }
  0x29   : > { %s756_s0 = scalar_lea.vmem %s246_s29, 128  ;;  %s761_s16 = sshll.u32 %s858_s14, 4  ;;  %s762_s16 = int_to_ptr.vmem [resolvable:$false] %s761_s16 }
  0x2a   : > { %p757_p12 = scmp.ne.s32.totalorder %s246_s29, %s756_s0  ;;  %s763_s24 = scalar_lea.vmem %s762_s16, 256 }
  0x2b   : > { %p764_p1 = scmp.lt.s32.totalorder %s246_s29, %s762_s16  ;;  %p765_p2 = scmp.lt.s32.totalorder %s763_s24, %s756_s0 }
  0x2c   : > { %p759_p6 = pnand %p757_p12, %p717_p3 }
  0x2d   : > { %p766_p4 = por %p765_p2, %p764_p1 }
  0x2e   : > { %p760_p7 = pneg %p759_p6 }
  0x30   : > { %p767_p10 = pnand %p766_p4, %p760_p7 }
  0x32   : > { %770 = shalt.err (!%p767_p10)
}
  0x33   : > { %655 = dma.hbm_to_vmem [thread:$0]  (!%p966_p0), %s243_s25, 128, %s246_s29, %s232_s28  }
  0x34   : > { %254 = sbr.rel (%p984_p5) target bundleno = 284 (0x11c), region = 40  ;;  %s1000_s9 = sand.u32 (!%p984_p5), 1, %s839_s19  }
  0x35   : > { %s1003_s10 = sshll.u32 (!%p984_p5), %s1000_s9, 3  ;;  %s257_s11 = scalar_lea.sflag (!%p984_p5), [#allocation3], %s1000_s9 }
  0x36   : > { %s260_s0 = scalar_lea.vmem (!%p984_p5), [#allocation2], %s1003_s10 }
  0x39   : > { %822 = dma.done.wait (%p939_p8), %s257_s11, 128  }
  0x3a   : > { %824 = vsyncadd (%p939_p8), %s257_s11, 4294967168  ;;  %s266_s17 = scalar_lea.sflag [#allocation6], %s1000_s9  ;;  %s269_s12 = scalar_lea.vmem [#allocation5], %s1003_s10 }
  0x3b   : > { %826 = dma.done.wait (%p939_p8), %s266_s17, 128  }
  0x3c   : > { %828 = vsyncadd (%p939_p8), %s266_s17, 4294967168  ;;  %v859_v0 = vmov 0.0   ;;  %v860_v1 = vmov 0   ;;  %v305_v2 = vld [vmem:[%s269_s12] sm:$0xff]  ;;  %vm314_vm0 = vcmask 1043456   ;;  %v304_v3 = vld [vmem:[%s260_s0] sm:$0xff] }
  0x3d   : > { %383 = vmatprep.mubr.f32.mxu0 %v859_v0  ;;  %463 = vmatprep.mubr.f32.mxu1 %v859_v0  ;;  %v309_v4 = vcombine.high %v305_v2, %v305_v2  ;;  %v391_v5 = vcombine.high %v304_v3, %v304_v3  ;;  %v470_v6 = vld [vmem:[%s1071_s4] sm:$0xf]  ;;  %vm310_vm1 = vcmask 31744   ;;  %s642_s28 = sshll.u32 %s847_s21, 7  ;;  %s300_s14 = scalar_lea.vmem [#allocation7], %s1003_s10 }
  0x3e   : > { %712 = vset.pattern.permute.xlu0 %v860_v1  ;;  %v307_v7 = vld [vmem:[%s1070_s3] sm:$0xf]  ;;  %s505_s16 = sshll.u32 %s300_s14, 4  ;;  %s503_s0 = scalar_lea.hbm %s1072_s5, %s642_s28  ;;  %s506_s16 = int_to_ptr.vmem [resolvable:$true] %s505_s16 }
  0x3f   : > { %v306_v8 = vld [vmem:[%s1069_s2] sm:$0xf]  ;;  %473 = vperm.xlu0 %712, %v470_v6   ;;  %629 = vmatprep.subr.msk.mxu0 %vm314_vm0, %v309_v4  ;;  %s489_s17 = scalar_lea.sflag [#allocation4], %s1000_s9  ;;  %s771_s12 = scalar_lea.vmem %s506_s16, 128 }
  0x40   : > { %632 = vmatprep.subr.msk.mxu1 %vm314_vm0, %v391_v5  ;;  %630 = vmatpush1.msk.msra.mxu0 %vm314_vm0, %v305_v2  ;;  %p772_p8 = scmp.ne.s32.totalorder %s506_s16, %s771_s12  ;;  %s861_s13 = smov [#allocation7]  }
  0x41   : > { %633 = vmatpush1.msk.msra.mxu1 %vm314_vm0, %v304_v3  ;;  %631 = vmatmul.mubr.msk.f32.vlgmr.msra.gmra.mxu0 %vm310_vm1, %v307_v7  ;;  %s775_s15 = sshll.u32 %s861_s13, 4  ;;  %s776_s15 = int_to_ptr.vmem [resolvable:$false] %s775_s15 }
  0x42   : > { %634 = vmatmul.mubr.msk.f32.vlgmr.msra.gmra.mxu1 %vm310_vm1, %v306_v8  ;;  %p773_p0 = pnand %p772_p8, %p943_p9  ;;  %s777_s21 = scalar_lea.vmem %s776_s15, 256 }
  0x43   : > { %p778_p13 = scmp.lt.s32.totalorder %s506_s16, %s776_s15  ;;  %p779_p5 = scmp.lt.s32.totalorder %s777_s21, %s771_s12 }
  0x44   : > { %p774_p3 = pneg %p773_p0 }
  0x45   : > { %p780_p12 = por %p779_p5, %p778_p13 }
  0x47   : > { %p781_p6 = pnand %p780_p12, %p774_p3 }
  0xba   : > { %v474_v9 = vpop.permute.xlu0 %473 }
 0x101   : > { %v385_v10 = vpop.f32.mrf.mxu0 }
 0x102   : > { %v465_v11 = vpop.f32.mrf.mxu1 }
 0x103   : > { %v466_v12 = vadd.f32 %v465_v11, %v385_v10  ;;  %v387_v13 = vpop.f32.mrf.mxu0 }
 0x104   : > { %v467_v14 = vpop.f32.mrf.mxu1 }
 0x105   : > { %v476_v15 = vadd.f32 %v474_v9, %v466_v12  ;;  %v468_v16 = vadd.f32 %v467_v14, %v387_v13 }
 0x107   : > { %v479_v17 = vadd.f32 %v476_v15, %v304_v3  ;;  %v477_v18 = vadd.f32 %v474_v9, %v468_v16 }
 0x109   : > { %v480_v19 = vadd.f32 %v477_v18, %v391_v5  ;;  %v481_v20 = vmax.f32 %v479_v17, 0.0 }
 0x10b   : > { %v482_v21 = vmax.f32 %v480_v19, 0.0 }
 0x10d   : > { %v485_v22 = vcombine.low %v481_v20, %v482_v21 }
 0x10f   : > { %487 = vst [vmem:[%s300_s14] sm:$0xff] %v485_v22 }
 0x110   : > { %784 = shalt.err (!%p781_p6)
}
 0x111   : > { %s785_s10 = scalar_lea.hbm %s503_s0, 128  ;;  %s789_s27 = scalar_lea.hbm %s1072_s5, 256 }
 0x112   : > { %p786_p7 = scmp.ne.s32.totalorder %s503_s0, %s785_s10  ;;  %p790_p4 = scmp.lt.s32.totalorder %s503_s0, %s1072_s5 }
 0x113   : > { %p791_p10 = scmp.lt.s32.totalorder %s789_s27, %s785_s10 }
 0x114   : > { %p787_p1 = pnand %p786_p7, %p943_p9 }
 0x115   : > { %p792_p8 = por %p791_p10, %p790_p4 }
 0x116   : > { %p788_p2 = pneg %p787_p1 }
 0x118   : > { %p793_p0 = pnand %p792_p8, %p788_p2 }
 0x11a   : > { %796 = shalt.err (!%p793_p0)
}
 0x11b   : > { %647 = dma.vmem_to_hbm [thread:$0]  (%p943_p9), %s506_s16, 128, %s503_s0, %s489_s17  }
 0x11c PF: > { %s517_s28 = sand.u32 1, %s835_s18   ;;  %p1081_p3 = scmp.ge.s32.totalorder %s855_s23, 2 }
 0x11d   : > { %s518_s14 = scalar_lea.sflag [#allocation4], %s517_s28 }
 0x11e   : > { %p657_p13 = pnand %p1081_p3, %p950_p11 }
 0x120   : > { %p658_p5 = pneg %p657_p13 }
 0x122   : > { %830 = dma.done.wait (%p658_p5), %s518_s14, 128  }
 0x123   : > { %832 = vsyncadd (%p658_p5), %s518_s14, 4294967168  ;;  %s24_s23 = sadd.s32 1, %s855_s23   ;;  %s1082_s18 = smov %s839_s19 }
 0x124   : > { %p21_p12 = scmp.ge.s32.totalorder %s24_s23, 4   ;;  %s1083_s19 = smov %s843_s20 }
 0x125   : > { %s1084_s20 = smov %s948_s7  ;;  %s1085_s21 = smov %s851_s22 }
 0x126   : > { %s1086_s22 = smov %s1088_s26  ;;  %23 = sbr.rel (!%p21_p12) target bundleno = 10 (0xa), region = 98 }
 0x12b   :  { %523 = vsyncpa [#allocation3], 1 }
 0x12c   :  { %525 = vsyncpa [#allocation3 + $0x1], 1 }
 0x12d   :  { %526 = vsyncpa [#allocation6], 1 }
 0x12e   :  { %528 = vsyncpa [#allocation6 + $0x1], 1 }
 0x12f   :  { %529 = vsyncpa [#allocation4], 1 }
 0x130   :  { %531 = vsyncpa [#allocation4 + $0x1], 1 }

</bundles_post_ra>
